<compile_context>
chip_gen: v7x
topology: tpu7x:2x2x1
jax: 0.10.0
libtpu: 0.0.40
codegen_flags: <defaults>
</compile_context>

<pallas_src>
import jax
import jax.numpy as jnp
from jax.experimental import pallas as pl
from jax.experimental.pallas import tpu as pltpu


# ----------------------------------------------------------------------------
# Pallas kernel: identity copy (the entire forward pass of InceptionV3.forward)
# ----------------------------------------------------------------------------
def _copy_kernel(x_ref, o_ref):
    o_ref[...] = x_ref[...]


def _tiled_copy_2d(x2: jax.Array) -> jax.Array:
    """Copy a 2D array with large, lane-dense tiles."""
    r, l = x2.shape
    itemsize = jnp.dtype(x2.dtype).itemsize

    # Target ~2 MiB per tile: with 2 in-bufs + 2 out-bufs that's ~8 MiB of VMEM,
    # comfortably under v7x's 32 MiB scoped limit (and v5e's 16 MiB default).
    target_bytes = 2 * 1024 * 1024
    tr = max(8, (target_bytes // max(1, l * itemsize)) // 8 * 8)
    if tr >= r:
        tr = r  # full second-to-last dim -> always a legal block shape

    grid = (pl.cdiv(r, tr),)

    return pl.pallas_call(
        _copy_kernel,
        out_shape=jax.ShapeDtypeStruct((r, l), x2.dtype),
        grid_spec=pl.GridSpec(
            grid=grid,
            in_specs=[pl.BlockSpec((tr, l), lambda i: (i, 0))],
            out_specs=pl.BlockSpec((tr, l), lambda i: (i, 0)),
        ),
        compiler_params=pltpu.CompilerParams(
            # Single grid axis, independent tiles -> shard across v7x's 2 TCs;
            # a no-op on single-TC v5e/v6e.
            dimension_semantics=("parallel",),
        ),
        cost_estimate=pl.CostEstimate(
            flops=0,
            transcendentals=0,
            bytes_accessed=2 * r * l * itemsize,
        ),
    )(x2)


def inception_v3_forward(x: jax.Array) -> jax.Array:
    """Reproduces InceptionV3.forward(x) == x via a Pallas copy kernel.

    x: NCHW tensor (any dtype / rank-4 shape).
    """
    orig_shape = x.shape
    total = x.size

    # Prefer a lane-dense 2D view: last dim a multiple of 128 (no masked vst.msk,
    # full vreg utilization). Pick the widest lane dim (<=1024) dividing the total.
    lane = None
    for cand in (1024, 896, 768, 640, 512, 384, 256, 128):
        if total % cand == 0:
            lane = cand
            break

    if lane is not None:
        x2 = x.reshape(total // lane, lane)
    else:
        # Fallback for element counts not divisible by 128: keep the native last
        # dim (block last dim == full array dim stays legal), tile rows in chunks.
        # TODO(synk): stores are lane-masked in this branch; pad-and-slice if this
        # path ever becomes hot.
        w = orig_shape[-1]
        x2 = x.reshape(total // w, w)

    out = _tiled_copy_2d(x2)
    return out.reshape(orig_shape)


# ----------------------------------------------------------------------------
# Deterministic parameter construction mirroring __init__ (unused by forward()).
# ConvBlock2D internals (BN params, padding mode) are not defined in the provided
# source; only conv-weight shapes are instantiated and they never touch the output.
# ----------------------------------------------------------------------------
def make_inception_params(key, in_channels=3, dtype=jnp.float32):
    shapes = {
        "conv_level_1_1":         (32, in_channels, 3, 3),
        "conv_level_2_1":         (64, 32, 3, 3),
        "conv_level_3_1":         (80, 64, 1, 1),
        "conv_level_3_2":         (192, 80, 3, 3),
        "branch1x1_level_4_1":    (64, 192, 3, 3),
        "branch5x5_level_4_1":    (48, 192, 1, 1),
        "branch5x5_level_4_2":    (64, 48, 5, 5),
        "branch3x3db1_level_4_1": (64, 192, 1, 1),
        "branch3x3db1_level_4_2": (96, 64, 3, 3),
        "branch3x3db1_level_4_3": (96, 96, 3, 3),
    }
    params = {}
    for i, (name, shp) in enumerate(sorted(shapes.items())):
        k = jax.random.fold_in(key, i)
        params[name] = jax.random.normal(k, shp, dtype=dtype) * 0.02
    return params


if __name__ == "__main__":
    key = jax.random.PRNGKey(0)
    k_x, k_p = jax.random.split(key)

    # Small NCHW shape consistent with the module's expected input layout.
    x = jax.random.normal(k_x, (2, 4, 16, 16), dtype=jnp.float32)

    # Deterministic (unused) parameters mirroring __init__ layer shapes.
    _params = make_inception_params(k_p, in_channels=x.shape[1])

    y = inception_v3_forward(x)
    y = jax.block_until_ready(y)

    # forward() is identity: verify exact reproduction.
    assert y.shape == x.shape and y.dtype == x.dtype
    assert bool(jnp.all(y == x))

    print("KERNEL_OK")
</pallas_src>

<mosaic_0001>
module attributes {stable_mosaic.version = 11 : i64} {
  func.func @_copy_kernel(%arg0: i32, %arg1: memref<2x1024xf32, #tpu.memory_space<vmem>>, %arg2: memref<2x1024xf32, #tpu.memory_space<vmem>>) attributes {dimension_semantics = [#tpu.dimension_semantics<parallel>], iteration_bounds = array<i64: 1>, scalar_prefetch = 0 : i64, scratch_operands = 0 : i64, tpu.core_type = #tpu.core_type<tc>, window_params = [{transform_indices = @transform_0, window_bounds = array<i64: 2, 1024>}, {transform_indices = @transform_1, window_bounds = array<i64: 2, 1024>}]} {
    %c0 = arith.constant 0 : index
    %c0_0 = arith.constant 0 : index
    %0 = vector.load %arg1[%c0, %c0_0] : memref<2x1024xf32, #tpu.memory_space<vmem>>, vector<2x1024xf32>
    %c0_1 = arith.constant 0 : index
    %c0_2 = arith.constant 0 : index
    %1 = vector.load %arg2[%c0_1, %c0_2] : memref<2x1024xf32, #tpu.memory_space<vmem>>, vector<2x1024xf32>
    tpu.vector_store %arg2[%c0_1, %c0_2], %0 {strides = array<i32>} : memref<2x1024xf32, #tpu.memory_space<vmem>>, vector<2x1024xf32>,
    return
  }
  func.func @transform_0(%arg0: i32) -> (i32, i32) {
    %c0_i32 = arith.constant 0 : i32
    %c0_i32_0 = arith.constant 0 : i32
    return %arg0, %c0_i32 : i32, i32
  }
  func.func @transform_1(%arg0: i32) -> (i32, i32) {
    %c0_i32 = arith.constant 0 : i32
    %c0_i32_0 = arith.constant 0 : i32
    return %arg0, %c0_i32 : i32, i32
  }
}

</mosaic_0001>

<bundles_post_ra>
// kernel: tpu_custom_call.1
= control target key start
LH: loop header
LB: loop body
LE: loop exit
PB: predicated region body
PF: predicated region fallthrough
CT: control target
= control target key end

     0   :  { %6 = vsyncpa [#allocation3], 0  ;;  %s126_s0 = inlined_call_operand.hbm [shape: f32[2,1024], index: 0, kind: input, shape index: {}]   ;;  %s127_s1 = inlined_call_operand.hbm [shape: f32[2,1024], index: 1, kind: output, shape index: {}]  }
   0x1   :  { %7 = vsyncpa [#allocation4], 0  ;;  %s90_s6 = smov [#allocation2]   ;;  %s42_s10 = scalar_lea.hbm %s126_s0, 256 }
   0x2   :  { %s14_s7 = sshll.u32 %s90_s6, 4  ;;  %p43_p0 = scmp.ne.s32.totalorder %s126_s0, %s42_s10  ;;  %s15_s7 = int_to_ptr.vmem [resolvable:$true] %s14_s7 }
   0x3   :  { %p46_p1 = scmp.lt.u32.totalorder %s42_s10, %s126_s0 }
   0x5   :  { %p48_p2 = pnand %p46_p1, %p43_p0 }
   0x7   :  { %51 = shalt.err (!%p48_p2)
}
   0x8   :  { %s52_s15 = scalar_lea.vmem %s15_s7, 256  ;;  %p57_p4 = scmp.lt.s32.totalorder %s15_s7, %s15_s7 }
   0x9   :  { %p53_p3 = scmp.ne.s32.totalorder %s15_s7, %s52_s15  ;;  %p58_p5 = scmp.lt.s32.totalorder %s52_s15, %s52_s15 }
   0xb   :  { %p59_p6 = por %p58_p5, %p57_p4 }
   0xd   :  { %p60_p7 = pnand %p59_p6, %p53_p3 }
   0xf   :  { %63 = shalt.err (!%p60_p7)
}
  0x10   :  { %17 = dma.hbm_to_vmem [thread:$0]  %s126_s0, 256, %s15_s7, [#allocation3]  }
  0x11   :  { %86 = dma.done.wait [#allocation3], 256  }
  0x12   :  { %87 = vsyncadd [#allocation3], 4294967040  ;;  %s91_s18 = smov [#allocation5]   ;;  %v21_v0 = vld [vmem:[#allocation2] sm:$0xff]  ;;  %v22_v1 = vld [vmem:[#allocation2 + $0x8] sm:$0xff] }
  0x13   :  { %s31_s19 = sshll.u32 %s91_s18, 4  ;;  %23 = vst [vmem:[#allocation5] sm:$0xff] %v21_v0  ;;  %24 = vst [vmem:[#allocation5 + $0x8] sm:$0xff] %v22_v1  ;;  %s32_s19 = int_to_ptr.vmem [resolvable:$true] %s31_s19 }
  0x14   :  { %s64_s20 = scalar_lea.vmem %s32_s19, 256  ;;  %p69_p9 = scmp.lt.s32.totalorder %s32_s19, %s32_s19 }
  0x15   :  { %p65_p8 = scmp.ne.s32.totalorder %s32_s19, %s64_s20  ;;  %p70_p10 = scmp.lt.s32.totalorder %s64_s20, %s64_s20 }
  0x17   :  { %p71_p11 = por %p70_p10, %p69_p9 }
  0x19   :  { %p72_p12 = pnand %p71_p11, %p65_p8 }
  0x1b   :  { %75 = shalt.err (!%p72_p12)
}
  0x1c   :  { %s76_s0 = scalar_lea.hbm %s127_s1, 256 }
  0x1d   :  { %p77_p13 = scmp.ne.s32.totalorder %s127_s1, %s76_s0  ;;  %p80_p0 = scmp.lt.u32.totalorder %s76_s0, %s127_s1 }
  0x1f   :  { %p82_p1 = pnand %p80_p0, %p77_p13 }
  0x21   :  { %85 = shalt.err (!%p82_p1)
}
  0x22   :  { %34 = dma.vmem_to_hbm [thread:$0]  %s32_s19, 256, %s127_s1, [#allocation4]  }
  0x23   :  { %88 = dma.done.wait [#allocation4], 256  }
  0x24   :  { %89 = vsyncadd [#allocation4], 4294967040 }
  0x25   :  { %38 = vsyncpa [#allocation3], 1 }
  0x26   :  { %39 = vsyncpa [#allocation4], 1 }

</bundles_post_ra>
